<compile_context>
chip_gen: v7x
topology: tpu7x:2x2x1
jax: 0.10.0
libtpu: 0.0.40
codegen_flags: <defaults>
</compile_context>

<pallas_src>
import functools

import jax
import jax.numpy as jnp
from jax.experimental import pallas as pl
from jax.experimental.pallas import tpu as pltpu


def probe_kernel(h1_ref, h2_ref, w1_ref, w2_ref, b_ref,
                 prob_ref, f1_ref, f2_ref, *, inv_s, s_total, ts):
    ks = pl.program_id(1)

    # Init the resident f32 accumulators (the feature outputs themselves).
    @pl.when(ks == 0)
    def _():
        f1_ref[...] = jnp.zeros_like(f1_ref)
        f2_ref[...] = jnp.zeros_like(f2_ref)

    h1 = h1_ref[...].astype(jnp.float32)          # (tb, ts, D)
    h2 = h2_ref[...].astype(jnp.float32)
    if s_total % ts != 0:
        # Mask garbage tokens in the padded final S block (static branch).
        tok = ks * ts + jax.lax.broadcasted_iota(jnp.int32, (1, ts, 1), 1)
        valid = tok < s_total
        h1 = jnp.where(valid, h1, 0.0)
        h2 = jnp.where(valid, h2, 0.0)

    f1_ref[...] += jnp.sum(h1, axis=1)            # (tb, D)
    f2_ref[...] += jnp.sum(h2, axis=1)

    @pl.when(ks == pl.num_programs(1) - 1)
    def _():
        f1 = f1_ref[...] * inv_s                  # mean-pool, f32
        f2 = f2_ref[...] * inv_s
        f1_ref[...] = f1
        f2_ref[...] = f2
        # probing_layer(concat([f1, f2], -1)) == sum(f1*W1 + f2*W2, -1) + b
        logits = jnp.sum(f1 * w1_ref[...] + f2 * w2_ref[...],
                         axis=-1, keepdims=True) + b_ref[0]
        prob_ref[...] = jax.nn.sigmoid(logits)    # (tb, 1)


def _vmem_capacity_bytes():
    try:
        return int(pltpu.get_tpu_info().vmem_capacity_bytes)
    except Exception:
        return 64 * 1024 * 1024   # conservative (v7x per-TC physical)


def _choose_tiles(B, S, D, in_itemsize, vmem_cap):
    """Pick (tb, ts, n_buf) so the per-step working set —
         2 inputs x n_buf x tb*ts*D*itemsize   (pipelined DMA buffers)
       + 2 x tb*ts*D*4                         (in-kernel f32 cast temps)
       fits comfortably in scoped VMEM on every generation, tb stays
       8-aligned (or == B), and the batch axis keeps multiple grid steps."""
    n_buf = 3 if vmem_cap >= 128 * 1024 * 1024 else 2
    budget = min(vmem_cap // 4, 32 * 1024 * 1024)

    # Batch tile: multiple of 8 (or full B), capped so the "parallel" axis
    # has >= 2 (ideally >= 4) steps for megacore sharding + pipelining.
    if B <= 8:
        tb = B
    else:
        max_tb = max(8, (B // 4) // 8 * 8)
        tb = min(64, max_tb)

    # Sequence tile: largest multiple of 8 fitting the budget (or full S).
    per_token_row = tb * D * (2 * n_buf * in_itemsize + 2 * 4)
    ts = max(8, (budget // max(per_token_row, 1)) // 8 * 8)
    if ts >= S:
        ts = S
    return tb, ts, n_buf


def probing_model_forward(hidden1, hidden2, weight, bias):
    """hidden1, hidden2: (B, S, D) encoder token embeddings (any float dtype).
    weight: (1, 2*D) probing-layer weight (PyTorch nn.Linear layout).
    bias:   (1,)     probing-layer bias.
    Returns (sigmoid(logits) (B,1), feat1 (B,D), feat2 (B,D)), all float32."""
    B, S, D = hidden1.shape
    assert hidden2.shape == (B, S, D)
    assert weight.shape == (1, 2 * D)

    # Split the concat-Linear weight into its two halves, lane-dense (1, D).
    w1 = weight[:, :D].astype(jnp.float32)              # (1, D)
    w2 = weight[:, D:].astype(jnp.float32)              # (1, D)
    b = bias.astype(jnp.float32).reshape(1)             # (1,) -> SMEM scalar

    vmem_cap = _vmem_capacity_bytes()
    itemsize = jnp.dtype(hidden1.dtype).itemsize
    tb, ts, n_buf = _choose_tiles(B, S, D, itemsize, vmem_cap)

    grid_b = pl.cdiv(B, tb)
    grid_s = pl.cdiv(S, ts)
    grid = (grid_b, grid_s)

    # Deeper input buffering only when VMEM is plentiful and there is enough
    # grid work to overlap (v5e/v6e); default double-buffering on v7x.
    h_spec_kwargs = {}
    if n_buf > 2 and grid_b * grid_s >= n_buf:
        h_spec_kwargs = dict(pipeline_mode=pl.Buffered(n_buf))
    h_spec = pl.BlockSpec((tb, ts, D), lambda i, k: (i, k, 0), **h_spec_kwargs)
    w_spec = pl.BlockSpec((1, D), lambda i, k: (0, 0))

    out_shapes = (
        jax.ShapeDtypeStruct((B, 1), jnp.float32),       # sigmoid(output)
        jax.ShapeDtypeStruct((B, D), jnp.float32),       # image1_features
        jax.ShapeDtypeStruct((B, D), jnp.float32),       # image2_features
    )

    kernel = functools.partial(probe_kernel, inv_s=1.0 / float(S),
                               s_total=S, ts=ts)

    return pl.pallas_call(
        kernel,
        out_shape=out_shapes,
        grid_spec=pltpu.PrefetchScalarGridSpec(
            num_scalar_prefetch=0,
            grid=grid,
            in_specs=[
                h_spec,                                           # hidden1
                h_spec,                                           # hidden2
                w_spec,                                           # w1 (invariant)
                w_spec,                                           # w2 (invariant)
                pl.BlockSpec(memory_space=pltpu.MemorySpace.SMEM),  # bias
            ],
            out_specs=[
                pl.BlockSpec((tb, 1), lambda i, k: (i, 0)),
                pl.BlockSpec((tb, D), lambda i, k: (i, 0)),
                pl.BlockSpec((tb, D), lambda i, k: (i, 0)),
            ],
        ),
        compiler_params=pltpu.CompilerParams(
            dimension_semantics=("parallel", "arbitrary"),
            vmem_limit_bytes=int(min(vmem_cap // 2, 96 * 1024 * 1024)),
        ),
    )(hidden1, hidden2, w1, w2, b)


def reference_forward(hidden1, hidden2, weight, bias):
    f1 = jnp.mean(hidden1.astype(jnp.float32), axis=1)
    f2 = jnp.mean(hidden2.astype(jnp.float32), axis=1)
    combined = jnp.concatenate([f1, f2], axis=1)
    logits = combined @ weight.astype(jnp.float32).T + bias.astype(jnp.float32)
    return jax.nn.sigmoid(logits), f1, f2


if __name__ == "__main__":
    # Small synthetic shapes: batch=2, seq(tokens)=8, hidden(projection_dim)=32.
    B, S, D = 2, 8, 32
    key = jax.random.PRNGKey(0)
    k1, k2, kw, kb = jax.random.split(key, 4)

    hidden1 = jax.random.normal(k1, (B, S, D), dtype=jnp.float32)
    hidden2 = jax.random.normal(k2, (B, S, D), dtype=jnp.float32)

    # Probing-layer params: nn.Linear(2*D, 1) -> weight (1, 2D), bias (1,)
    bound = 1.0 / jnp.sqrt(2.0 * D)
    weight = jax.random.uniform(kw, (1, 2 * D), jnp.float32, -bound, bound)
    bias = jax.random.uniform(kb, (1,), jnp.float32, -bound, bound)

    probs, f1, f2 = probing_model_forward(hidden1, hidden2, weight, bias)
    jax.block_until_ready((probs, f1, f2))

    ref_p, ref_f1, ref_f2 = reference_forward(hidden1, hidden2, weight, bias)
    assert probs.shape == (B, 1) and f1.shape == (B, D) and f2.shape == (B, D)
    assert jnp.allclose(probs, ref_p, atol=1e-5)
    assert jnp.allclose(f1, ref_f1, atol=1e-5)
    assert jnp.allclose(f2, ref_f2, atol=1e-5)

    print("KERNEL_OK")
</pallas_src>

<mosaic_0001>
module attributes {stable_mosaic.version = 11 : i64} {
  func.func @probe_kernel(%arg0: i32, %arg1: i32, %arg2: memref<2x8x32xf32, #tpu.memory_space<vmem>>, %arg3: memref<2x8x32xf32, #tpu.memory_space<vmem>>, %arg4: memref<1x32xf32, #tpu.memory_space<vmem>>, %arg5: memref<1x32xf32, #tpu.memory_space<vmem>>, %arg6: memref<1xf32, #tpu.memory_space<smem>>, %arg7: memref<2x1xf32, #tpu.memory_space<vmem>>, %arg8: memref<2x32xf32, #tpu.memory_space<vmem>>, %arg9: memref<2x32xf32, #tpu.memory_space<vmem>>) attributes {dimension_semantics = [#tpu.dimension_semantics<parallel>, #tpu.dimension_semantics<arbitrary>], iteration_bounds = array<i64: 1, 1>, scalar_prefetch = 0 : i64, scratch_operands = 0 : i64, tpu.core_type = #tpu.core_type<tc>, window_params = [{transform_indices = @transform_0, window_bounds = array<i64: 2, 8, 32>}, {transform_indices = @transform_1, window_bounds = array<i64: 2, 8, 32>}, {pipeline_mode = #tpu.pipeline_mode<synchronous>, transform_indices = @transform_2, window_bounds = array<i64: 1, 32>}, {pipeline_mode = #tpu.pipeline_mode<synchronous>, transform_indices = @transform_3, window_bounds = array<i64: 1, 32>}, {transform_indices = @transform_4, window_bounds = array<i64: 1>}, {transform_indices = @transform_5, window_bounds = array<i64: 2, 1>}, {transform_indices = @transform_6, window_bounds = array<i64: 2, 32>}, {transform_indices = @transform_7, window_bounds = array<i64: 2, 32>}]} {
    %c0_i32 = arith.constant 0 : i32
    %0 = arith.cmpi eq, %arg1, %c0_i32 : i32
    %1 = arith.extui %0 : i1 to i32
    %c0_i32_0 = arith.constant 0 : i32
    %2 = arith.cmpi ne, %1, %c0_i32_0 : i32
    scf.if %2 {
      %cst_17 = arith.constant 0.000000e+00 : f32
      %16 = vector.broadcast %cst_17 : f32 to vector<2x32xf32>
      %c0_18 = arith.constant 0 : index
      %c0_19 = arith.constant 0 : index
      %17 = vector.load %arg8[%c0_18, %c0_19] : memref<2x32xf32, #tpu.memory_space<vmem>>, vector<2x32xf32>
      tpu.vector_store %arg8[%c0_18, %c0_19], %16 {strides = array<i32>} : memref<2x32xf32, #tpu.memory_space<vmem>>, vector<2x32xf32>,
      %cst_20 = arith.constant 0.000000e+00 : f32
      %18 = vector.broadcast %cst_20 : f32 to vector<2x32xf32>
      %c0_21 = arith.constant 0 : index
      %c0_22 = arith.constant 0 : index
      %19 = vector.load %arg9[%c0_21, %c0_22] : memref<2x32xf32, #tpu.memory_space<vmem>>, vector<2x32xf32>
      tpu.vector_store %arg9[%c0_21, %c0_22], %18 {strides = array<i32>} : memref<2x32xf32, #tpu.memory_space<vmem>>, vector<2x32xf32>,
    } else {
    }
    %c0 = arith.constant 0 : index
    %c0_1 = arith.constant 0 : index
    %c0_2 = arith.constant 0 : index
    %3 = vector.load %arg2[%c0, %c0_1, %c0_2] : memref<2x8x32xf32, #tpu.memory_space<vmem>>, vector<2x8x32xf32>
    %c0_3 = arith.constant 0 : index
    %c0_4 = arith.constant 0 : index
    %c0_5 = arith.constant 0 : index
    %4 = vector.load %arg3[%c0_3, %c0_4, %c0_5] : memref<2x8x32xf32, #tpu.memory_space<vmem>>, vector<2x8x32xf32>
    %c0_6 = arith.constant 0 : index
    %c0_7 = arith.constant 0 : index
    %5 = vector.load %arg8[%c0_6, %c0_7] : memref<2x32xf32, #tpu.memory_space<vmem>>, vector<2x32xf32>
    %cst = arith.constant dense<0.000000e+00> : vector<2x32xf32>
    %6 = vector.multi_reduction <add>, %3, %cst [1] : vector<2x8x32xf32> to vector<2x32xf32>
    %7 = arith.addf %5, %6 : vector<2x32xf32>
    %c0_8 = arith.constant 0 : index
    %c0_9 = arith.constant 0 : index
    %8 = vector.load %arg8[%c0_8, %c0_9] : memref<2x32xf32, #tpu.memory_space<vmem>>, vector<2x32xf32>
    tpu.vector_store %arg8[%c0_8, %c0_9], %7 {strides = array<i32>} : memref<2x32xf32, #tpu.memory_space<vmem>>, vector<2x32xf32>,
    %c0_10 = arith.constant 0 : index
    %c0_11 = arith.constant 0 : index
    %9 = vector.load %arg9[%c0_10, %c0_11] : memref<2x32xf32, #tpu.memory_space<vmem>>, vector<2x32xf32>
    %cst_12 = arith.constant dense<0.000000e+00> : vector<2x32xf32>
    %10 = vector.multi_reduction <add>, %4, %cst_12 [1] : vector<2x8x32xf32> to vector<2x32xf32>
    %11 = arith.addf %9, %10 : vector<2x32xf32>
    %c0_13 = arith.constant 0 : index
    %c0_14 = arith.constant 0 : index
    %12 = vector.load %arg9[%c0_13, %c0_14] : memref<2x32xf32, #tpu.memory_space<vmem>>, vector<2x32xf32>
    tpu.vector_store %arg9[%c0_13, %c0_14], %11 {strides = array<i32>} : memref<2x32xf32, #tpu.memory_space<vmem>>, vector<2x32xf32>,
    %c0_i32_15 = arith.constant 0 : i32
    %13 = arith.cmpi eq, %arg1, %c0_i32_15 : i32
    %14 = arith.extui %13 : i1 to i32
    %c0_i32_16 = arith.constant 0 : i32
    %15 = arith.cmpi ne, %14, %c0_i32_16 : i32
    scf.if %15 {
      %c0_17 = arith.constant 0 : index
      %c0_18 = arith.constant 0 : index
      %16 = vector.load %arg8[%c0_17, %c0_18] : memref<2x32xf32, #tpu.memory_space<vmem>>, vector<2x32xf32>
      %cst_19 = arith.constant 1.250000e-01 : f32
      %17 = vector.broadcast %cst_19 : f32 to vector<2x32xf32>
      %18 = arith.mulf %16, %17 : vector<2x32xf32>
      %c0_20 = arith.constant 0 : index
      %c0_21 = arith.constant 0 : index
      %19 = vector.load %arg9[%c0_20, %c0_21] : memref<2x32xf32, #tpu.memory_space<vmem>>, vector<2x32xf32>
      %cst_22 = arith.constant 1.250000e-01 : f32
      %20 = vector.broadcast %cst_22 : f32 to vector<2x32xf32>
      %21 = arith.mulf %19, %20 : vector<2x32xf32>
      %c0_23 = arith.constant 0 : index
      %c0_24 = arith.constant 0 : index
      %22 = vector.load %arg8[%c0_23, %c0_24] : memref<2x32xf32, #tpu.memory_space<vmem>>, vector<2x32xf32>
      tpu.vector_store %arg8[%c0_23, %c0_24], %18 {strides = array<i32>} : memref<2x32xf32, #tpu.memory_space<vmem>>, vector<2x32xf32>,
      %c0_25 = arith.constant 0 : index
      %c0_26 = arith.constant 0 : index
      %23 = vector.load %arg9[%c0_25, %c0_26] : memref<2x32xf32, #tpu.memory_space<vmem>>, vector<2x32xf32>
      tpu.vector_store %arg9[%c0_25, %c0_26], %21 {strides = array<i32>} : memref<2x32xf32, #tpu.memory_space<vmem>>, vector<2x32xf32>,
      %c0_27 = arith.constant 0 : index
      %c0_28 = arith.constant 0 : index
      %24 = vector.load %arg4[%c0_27, %c0_28] : memref<1x32xf32, #tpu.memory_space<vmem>>, vector<1x32xf32>
      %25 = vector.broadcast %24 : vector<1x32xf32> to vector<2x32xf32>
      %26 = arith.mulf %18, %25 : vector<2x32xf32>
      %c0_29 = arith.constant 0 : index
      %c0_30 = arith.constant 0 : index
      %27 = vector.load %arg5[%c0_29, %c0_30] : memref<1x32xf32, #tpu.memory_space<vmem>>, vector<1x32xf32>
      %28 = vector.broadcast %27 : vector<1x32xf32> to vector<2x32xf32>
      %29 = arith.mulf %21, %28 : vector<2x32xf32>
      %30 = arith.addf %26, %29 : vector<2x32xf32>
      %cst_31 = arith.constant dense<0.000000e+00> : vector<2xf32>
      %31 = vector.multi_reduction <add>, %30, %cst_31 [1] : vector<2x32xf32> to vector<2xf32>
      %32 = vector.shape_cast %31 : vector<2xf32> to vector<2x1xf32>
      %c0_32 = arith.constant 0 : index
      %33 = memref.load %arg6[%c0_32] : memref<1xf32, #tpu.memory_space<smem>>
      %34 = vector.broadcast %33 : f32 to vector<2x1xf32>
      %35 = arith.addf %32, %34 : vector<2x1xf32>
      %36 = arith.negf %35 : vector<2x1xf32>
      %37 = math.exp %36 : vector<2x1xf32>
      %cst_33 = arith.constant 1.000000e+00 : f32
      %38 = vector.broadcast %cst_33 : f32 to vector<2x1xf32>
      %39 = arith.addf %38, %37 : vector<2x1xf32>
      %40 = arith.divf %38, %39 : vector<2x1xf32>
      %c0_34 = arith.constant 0 : index
      %c0_35 = arith.constant 0 : index
      %41 = vector.load %arg7[%c0_34, %c0_35] : memref<2x1xf32, #tpu.memory_space<vmem>>, vector<2x1xf32>
      tpu.vector_store %arg7[%c0_34, %c0_35], %40 {strides = array<i32>} : memref<2x1xf32, #tpu.memory_space<vmem>>, vector<2x1xf32>,
    } else {
    }
    return
  }
  func.func @transform_0(%arg0: i32, %arg1: i32) -> (i32, i32, i32) {
    %c0_i32 = arith.constant 0 : i32
    %c0_i32_0 = arith.constant 0 : i32
    return %arg0, %arg1, %c0_i32 : i32, i32, i32
  }
  func.func @transform_1(%arg0: i32, %arg1: i32) -> (i32, i32, i32) {
    %c0_i32 = arith.constant 0 : i32
    %c0_i32_0 = arith.constant 0 : i32
    return %arg0, %arg1, %c0_i32 : i32, i32, i32
  }
  func.func @transform_2(%arg0: i32, %arg1: i32) -> (i32, i32) {
    %c0_i32 = arith.constant 0 : i32
    %c0_i32_0 = arith.constant 0 : i32
    %c0_i32_1 = arith.constant 0 : i32
    return %c0_i32, %c0_i32_0 : i32, i32
  }
  func.func @transform_3(%arg0: i32, %arg1: i32) -> (i32, i32) {
    %c0_i32 = arith.constant 0 : i32
    %c0_i32_0 = arith.constant 0 : i32
    %c0_i32_1 = arith.constant 0 : i32
    return %c0_i32, %c0_i32_0 : i32, i32
  }
  func.func @transform_4(%arg0: i32, %arg1: i32) -> i32 {
    %c0_i32 = arith.constant 0 : i32
    %c0_i32_0 = arith.constant 0 : i32
    return %c0_i32 : i32
  }
  func.func @transform_5(%arg0: i32, %arg1: i32) -> (i32, i32) {
    %c0_i32 = arith.constant 0 : i32
    %c0_i32_0 = arith.constant 0 : i32
    return %arg0, %c0_i32 : i32, i32
  }
  func.func @transform_6(%arg0: i32, %arg1: i32) -> (i32, i32) {
    %c0_i32 = arith.constant 0 : i32
    %c0_i32_0 = arith.constant 0 : i32
    return %arg0, %c0_i32 : i32, i32
  }
  func.func @transform_7(%arg0: i32, %arg1: i32) -> (i32, i32) {
    %c0_i32 = arith.constant 0 : i32
    %c0_i32_0 = arith.constant 0 : i32
    return %arg0, %c0_i32 : i32, i32
  }
}

</mosaic_0001>

<bundles_post_ra>
// kernel: tpu_custom_call.1
= control target key start
LH: loop header
LB: loop body
LE: loop exit
PB: predicated region body
PF: predicated region fallthrough
CT: control target
= control target key end

     0   :  { %14 = vsyncpa [#allocation4], 0  ;;  %s408_s0 = inlined_call_operand.hbm [shape: f32[2,8,32], index: 0, kind: input, shape index: {}]   ;;  %s409_s1 = inlined_call_operand.hbm [shape: f32[2,8,32], index: 1, kind: input, shape index: {}]   ;;  %s410_s2 = inlined_call_operand.vmem [shape: f32[1,32], index: 2, kind: input, shape index: {}]   ;;  %s411_s3 = inlined_call_operand.vmem [shape: f32[1,32], index: 3, kind: input, shape index: {}]   ;;  %s412_s4 = inlined_call_operand.<no memory space> [shape: f32[1], index: 4, kind: input, shape index: {}]   ;;  %s413_s5 = inlined_call_operand.vmem [shape: f32[2,1], index: 5, kind: output, shape index: {0}]   ;;  %s414_s6 = inlined_call_operand.hbm [shape: f32[2,32], index: 6, kind: output, shape index: {1}]   ;;  %s415_s7 = inlined_call_operand.hbm [shape: f32[2,32], index: 7, kind: output, shape index: {2}]  }
   0x1   :  { %15 = vsyncpa [#allocation7], 0 }
   0x2   :  { %16 = vsyncpa [#allocation5], 0 }
   0x3   :  { %17 = vsyncpa [#allocation10], 0  ;;  %s294_s24 = smov [#allocation3]   ;;  %s198_s28 = scalar_lea.hbm %s408_s0, 256 }
   0x4   :  { %s23_s25 = sshll.u32 %s294_s24, 4  ;;  %p199_p0 = scmp.ne.s32.totalorder %s408_s0, %s198_s28  ;;  %s24_s25 = int_to_ptr.vmem [resolvable:$true] %s23_s25 }
   0x5   :  { %p202_p1 = scmp.lt.u32.totalorder %s198_s28, %s408_s0 }
   0x7   :  { %p204_p2 = pnand %p202_p1, %p199_p0 }
   0x9   :  { %207 = shalt.err (!%p204_p2)
}
   0xa   :  { %s208_s10 = scalar_lea.vmem %s24_s25, 256  ;;  %p213_p4 = scmp.lt.s32.totalorder %s24_s25, %s24_s25 }
   0xb   :  { %p209_p3 = scmp.ne.s32.totalorder %s24_s25, %s208_s10  ;;  %p214_p5 = scmp.lt.s32.totalorder %s208_s10, %s208_s10 }
   0xd   :  { %p215_p6 = por %p214_p5, %p213_p4 }
   0xf   :  { %p216_p7 = pnand %p215_p6, %p209_p3 }
  0x11   :  { %219 = shalt.err (!%p216_p7)
}
  0x12   :  { %s295_s11 = smov 128   ;;  %s296_s12 = smov 8  }
  0x13   :  { %29 = dma.hbm_to_vmem [thread:$0]  %s408_s0, 256, %s24_s25, [#allocation4], %s295_s11, %s295_s11, %s296_s12  }
  0x14   :  { %s297_s15 = smov [#allocation6]   ;;  %s220_s19 = scalar_lea.hbm %s409_s1, 256 }
  0x15   :  { %s35_s16 = sshll.u32 %s297_s15, 4  ;;  %p221_p8 = scmp.ne.s32.totalorder %s409_s1, %s220_s19  ;;  %s36_s16 = int_to_ptr.vmem [resolvable:$true] %s35_s16 }
  0x16   :  { %p224_p9 = scmp.lt.u32.totalorder %s220_s19, %s409_s1 }
  0x18   :  { %p226_p10 = pnand %p224_p9, %p221_p8 }
  0x1a   :  { %229 = shalt.err (!%p226_p10)
}
  0x1b   :  { %s230_s24 = scalar_lea.vmem %s36_s16, 256  ;;  %p235_p12 = scmp.lt.s32.totalorder %s36_s16, %s36_s16 }
  0x1c   :  { %p231_p11 = scmp.ne.s32.totalorder %s36_s16, %s230_s24  ;;  %p236_p13 = scmp.lt.s32.totalorder %s230_s24, %s230_s24 }
  0x1e   :  { %p237_p0 = por %p236_p13, %p235_p12 }
  0x20   :  { %p238_p1 = pnand %p237_p0, %p231_p11 }
  0x22   :  { %241 = shalt.err (!%p238_p1)
}
  0x23   :  { %41 = dma.hbm_to_vmem [thread:$0]  %s409_s1, 256, %s36_s16, [#allocation7], %s295_s11, %s295_s11, %s296_s12  }
  0x24   :  { %286 = dma.done.wait [#allocation4], 256  }
  0x25   :  { %287 = vsyncadd [#allocation4], 4294967040 }
  0x26   :  { %288 = dma.done.wait [#allocation7], 256  }
  0x27   :  { %289 = vsyncadd [#allocation7], 4294967040  ;;  %vm58_vm0 = vcmask 254976   ;;  %v298_v0 = vmov 0.0   ;;  %vm66_vm1 = vcmask 261120   ;;  %v61_v1 = vld [vmem:[#allocation3] sm:$0xff] }
  0x28   :  { %59 = vst.msk [vmem:[#allocation8] sm:$0x3] %vm58_vm0, %v298_v0  ;;  %60 = vst.msk [vmem:[#allocation9] sm:$0x3] %vm58_vm0, %v298_v0  ;;  %v62_v2 = vld [vmem:[#allocation3 + $0x8] sm:$0xff]  ;;  %v63_v3 = vld [vmem:[#allocation6] sm:$0xff] }
  0x29   :  { %v64_v4 = vld [vmem:[#allocation6 + $0x8] sm:$0xff]  ;;  %v67_v5 = vsel %vm66_vm1, %v61_v1, 0.0  ;;  %v74_v6 = vsel %vm66_vm1, %v62_v2, 0.0  ;;  %v90_v7 = vsel %vm66_vm1, %v63_v3, 0.0  ;;  %vm83_vm2 = vcmask 1041409   ;;  %s299_s29 = smov [#allocation8]  }
  0x2a   :  { %v68_v8 = vrot.slane %v67_v5, 4  ;;  %v75_v9 = vrot.slane %v74_v6, 4  ;;  %v91_v10 = vrot.slane %v90_v7, 4  ;;  %v97_v11 = vsel %vm66_vm1, %v64_v4, 0.0  ;;  %v184_v40 = vld [vmem:[%s410_s2] ss:$0 sm:$0xff] }
  0x2b   :  { %v98_v12 = vrot.slane %v97_v11, 4  ;;  %v185_v43 = vld [vmem:[%s411_s3] ss:$0 sm:$0xff]  ;;  %s158_s30 = sshll.u32 %s299_s29, 4  ;;  %s300_s2 = smov [#allocation9]   ;;  %s159_s30 = int_to_ptr.vmem [resolvable:$true] %s158_s30 }
  0x2c   :  { %v69_v13 = vadd.f32 %v68_v8, %v67_v5  ;;  %v76_v14 = vadd.f32 %v75_v9, %v74_v6  ;;  %v92_v15 = vadd.f32 %v91_v10, %v90_v7  ;;  %s168_s8 = sshll.u32 %s300_s2, 4  ;;  %s242_s9 = scalar_lea.vmem %s159_s30, 32  ;;  %s169_s8 = int_to_ptr.vmem [resolvable:$true] %s168_s8 }
  0x2d   :  { %v99_v16 = vadd.f32 %v98_v12, %v97_v11  ;;  %p243_p2 = scmp.ne.s32.totalorder %s159_s30, %s242_s9  ;;  %p247_p3 = scmp.lt.s32.totalorder %s159_s30, %s159_s30 }
  0x2e   :  { %v70_v17 = vrot.slane %v69_v13, 2  ;;  %v77_v18 = vrot.slane %v76_v14, 2  ;;  %v93_v19 = vrot.slane %v92_v15, 2  ;;  %p248_p4 = scmp.lt.s32.totalorder %s242_s9, %s242_s9 }
  0x2f   :  { %v100_v20 = vrot.slane %v99_v16, 2  ;;  %v65_v29 = vld [vmem:[#allocation8] sm:$0x3]  ;;  %v89_v33 = vld [vmem:[#allocation9] sm:$0x3] }
  0x30   :  { %v71_v21 = vadd.f32 %v70_v17, %v69_v13  ;;  %v78_v22 = vadd.f32 %v77_v18, %v76_v14  ;;  %v94_v23 = vadd.f32 %v93_v19, %v92_v15  ;;  %p249_p5 = por %p248_p4, %p247_p3 }
  0x31   :  { %v101_v24 = vadd.f32 %v100_v20, %v99_v16 }
  0x32   :  { %v72_v25 = vrot.slane %v71_v21, 1  ;;  %v79_v26 = vrot.slane %v78_v22, 1  ;;  %v95_v27 = vrot.slane %v94_v23, 1  ;;  %p250_p6 = pnand %p249_p5, %p243_p2 }
  0x33   :  { %v102_v28 = vrot.slane %v101_v24, 1 }
  0x34   :  { %v73_v30 = vadd.f32 %v72_v25, %v71_v21  ;;  %v80_v31 = vadd.f32 %v79_v26, %v78_v22  ;;  %v96_v32 = vadd.f32 %v95_v27, %v94_v23 }
  0x35   :  { %v103_v34 = vadd.f32 %v102_v28, %v101_v24 }
  0x36   :  { %v84_v35 = vsel %vm83_vm2, %v80_v31, %v73_v30 }
  0x37   :  { %v86_v36 = vadd.f32 %v84_v35, %v65_v29  ;;  %v106_v37 = vsel %vm83_vm2, %v103_v34, %v96_v32 }
  0x38   :  { %v108_v38 = vadd.f32 %v106_v37, %v89_v33 }
  0x39   :  { %88 = vst.msk [vmem:[#allocation8] sm:$0x3] %vm58_vm0, %v86_v36 }
  0x3a   :  { %109 = vst.msk [vmem:[#allocation9] sm:$0x3] %vm58_vm0, %v108_v38 }
  0x40   :  { %v113_v39 = vld [vmem:[#allocation8] sm:$0x3] }
  0x41   :  { %v114_v41 = vmul.f32 0.125, %v113_v39  ;;  %v115_v42 = vld [vmem:[#allocation9] sm:$0x3] }
  0x42   :  { %v116_v44 = vmul.f32 0.125, %v115_v42 }
  0x43   :  { %v126_v45 = vmul.f32 %v184_v40, %v114_v41  ;;  %117 = vst.msk [vmem:[#allocation8] sm:$0x3] %vm58_vm0, %v114_v41 }
  0x44   :  { %v134_v46 = vmul.f32 %v185_v43, %v116_v44  ;;  %118 = vst.msk [vmem:[#allocation9] sm:$0x3] %vm58_vm0, %v116_v44 }
  0x46   :  { %v135_v47 = vadd.f32 %v134_v46, %v126_v45 }
  0x48   :  { %v136_v48 = vsel %vm58_vm0, %v135_v47, 0.0 }
  0x49   :  { %137 = vadd.xlane.f32.xlu0 %v136_v48 }
  0x4a   :  { %253 = shalt.err (!%p250_p6)
}
  0x4b   :  { %s254_s11 = scalar_lea.hbm %s414_s6, 32 }
  0x4c   :  { %p255_p7 = scmp.ne.s32.totalorder %s414_s6, %s254_s11  ;;  %p258_p8 = scmp.lt.u32.totalorder %s254_s11, %s414_s6 }
  0x4e   :  { %p260_p9 = pnand %p258_p8, %p255_p7 }
  0x50   :  { %263 = shalt.err (!%p260_p9)
}
  0x51   :  { %161 = dma.vmem_to_hbm [thread:$0]  %s159_s30, 32, %s414_s6, [#allocation5]  }
  0x52   :  { %s264_s18 = scalar_lea.vmem %s169_s8, 32  ;;  %p269_p11 = scmp.lt.s32.totalorder %s169_s8, %s169_s8 }
  0x53   :  { %p265_p10 = scmp.ne.s32.totalorder %s169_s8, %s264_s18  ;;  %p270_p12 = scmp.lt.s32.totalorder %s264_s18, %s264_s18 }
  0x55   :  { %p271_p13 = por %p270_p12, %p269_p11 }
  0x57   :  { %p272_p0 = pnand %p271_p13, %p265_p10 }
  0x59   :  { %275 = shalt.err (!%p272_p0)
}
  0x5a   :  { %s276_s21 = scalar_lea.hbm %s415_s7, 32 }
  0x5b   :  { %p277_p1 = scmp.ne.s32.totalorder %s415_s7, %s276_s21  ;;  %p280_p2 = scmp.lt.u32.totalorder %s276_s21, %s415_s7 }
  0x5d   :  { %p282_p3 = pnand %p280_p2, %p277_p1 }
  0x5f   :  { %285 = shalt.err (!%p282_p3)
}
  0x60   :  { %171 = dma.vmem_to_hbm [thread:$0]  %s169_s8, 32, %s415_s7, [#allocation10]   ;;  %v140_v49 = vstv %s412_s4  ;;  %vm148_vm3 = vcmask 1024  }
  0xd6   :  { %v138_v50 = vpop.xlane.xlu0 %137 }
  0xd7   :  { %v141_v51 = vadd.f32 %v140_v49, %v138_v50 }
  0xd9   :  { %v186_v52 = vmul.f32 -1.442695, %v141_v51 }
  0xdb   :  { %194 = vpow2.f32 %v186_v52 }
  0xe5   :  { %v195_v53 = vpop.eup %194 }
  0xe6   :  { %v145_v54 = vadd.f32 1.0, %v195_v53 }
  0xe8   :  { %196 = vrcp.f32 %v145_v54 }
  0xf2   :  { %v197_v55 = vpop.eup %196 }
  0xf3   :  { %149 = vst.msk [vmem:[%s413_s5] sm:$0x3] %vm148_vm3, %v197_v55 }
  0xf4   :  { %290 = dma.done.wait [#allocation5], 32  }
  0xf5   :  { %291 = vsyncadd [#allocation5], 4294967264 }
  0xf6   :  { %292 = dma.done.wait [#allocation10], 32  }
  0xf7   :  { %293 = vsyncadd [#allocation10], 4294967264 }
  0xf8   :  { %180 = vsyncpa [#allocation4], 1 }
  0xf9   :  { %181 = vsyncpa [#allocation7], 1 }
  0xfa   :  { %182 = vsyncpa [#allocation5], 1 }
  0xfb   :  { %183 = vsyncpa [#allocation10], 1 }

</bundles_post_ra>
